<compile_context>
chip_gen: v7x
topology: tpu7x:2x2x1
jax: 0.10.0
libtpu: 0.0.40
codegen_flags: <defaults>
</compile_context>

<pallas_src>
import jax
import jax.numpy as jnp
from jax.experimental import pallas as pl
from jax.experimental.pallas import tpu as pltpu


def _attn_kernel(x_ref, wt_ref, b_ref, vec_ref, probs_ref):
    """One grid step over a (Bb, T, D) batch block in native (B, T, D) layout.

    x_ref:     (Bb, T, D)  inputs block
    wt_ref:    (T, T)      nn.Linear weight, pre-transposed: wt[s, t] = W[t, s]
    b_ref:     (1, T, 1)   nn.Linear bias (broadcast over batch and D)
    vec_ref:   (Bb, 1, D)  attention_vec block
    probs_ref: (Bb, T, D)  attention_probs block
    """
    bb, T, D = x_ref.shape
    xf = x_ref[...].astype(jnp.float32)                       # (Bb, T, D)

    # logits[b, t, d] = sum_s x[b, s, d] * W[t, s]
    # Implemented with only well-supported in-kernel ops: a batched minor-dims
    # transpose (XLU), leading-dim reshapes, and one plain 2-D MXU matmul with
    # Bb*D rows.  All of this has large slack under the block DMA.
    xt = jnp.swapaxes(xf, 1, 2)                                # (Bb, D, S)
    logits = jnp.dot(xt.reshape(bb * D, T),
                     wt_ref[...].astype(jnp.float32),
                     preferred_element_type=jnp.float32)       # (Bb*D, T)
    s = jnp.swapaxes(logits.reshape(bb, D, T), 1, 2)           # (Bb, T, D)
    s = s + b_ref[...].astype(jnp.float32)

    # Softmax over the time axis (axis 1).  Exact normalization: the kernel is
    # memory-bound, so the exact reciprocal is free (EUP/VALU slack under DMA).
    s = s - jnp.max(s, axis=1, keepdims=True)
    e = jnp.exp(s)
    inv = pl.reciprocal(jnp.sum(e, axis=1, keepdims=True), approx=False)

    # Lane-layout-matching store in the native output layout (no un-transpose
    # left for the wrapper).
    probs_ref[...] = (e * inv).astype(probs_ref.dtype)
    # attention_vec from the unnormalized exponentials: one shared normalize.
    vec_ref[...] = (jnp.sum(e * xf, axis=1, keepdims=True) * inv).astype(vec_ref.dtype)


def _pad_up(n, m):
    return ((n + m - 1) // m) * m


def _vmem_capacity_bytes():
    """Best-effort physical VMEM capacity; conservative (v7x, 64 MiB) fallback."""
    try:
        info = pltpu.get_tpu_info()
        for name in ("vmem_capacity_bytes", "vmem_bytes", "vmem_size_bytes"):
            cap = getattr(info, name, None)
            if cap:
                return int(cap)
    except Exception:
        pass
    return 64 * 1024 * 1024


def _working_set_bytes(bb, T, D):
    """Conservative per-step VMEM estimate (f32, (8,128) tile padding included):
    double-buffered x/probs/vec blocks, resident W/bias, plus the live in-body
    f32 temporaries (x cast, softmax chain, and the (.., D, T)-layout matmul
    intermediates)."""
    tp8, t128 = _pad_up(max(T, 1), 8), _pad_up(max(T, 1), 128)
    d8, d128 = _pad_up(max(D, 1), 8), _pad_up(max(D, 1), 128)
    blk = bb * tp8 * d128 * 4            # one (bb, T, D) f32 block in VMEM
    blk_dt = bb * d8 * t128 * 4          # one (bb, D, T)-layout f32 temporary
    vec_blk = bb * 8 * d128 * 4          # one (bb, 1, D) block in VMEM
    ws = 2 * blk                         # x block, double-buffered
    ws += 2 * blk                        # probs block, double-buffered
    ws += 2 * vec_blk                    # vec block, double-buffered
    ws += 3 * blk + 2 * blk_dt           # in-body temporaries (xf, s/e; xt, logits)
    ws += 2 * (tp8 * t128 * 4)           # weight, double-buffered (resident)
    ws += 2 * (tp8 * 128 * 4)            # bias, double-buffered (resident)
    return ws


def _pick_block_batch(B, T, D, budget_bytes):
    """Largest batch block whose working set fits the budget, capped so there
    are at least two grid steps (v7x has 2 TensorCores); prefers a Bb that
    divides B (no padded tail block) unless that shrinks the block >1/3."""
    fixed = _working_set_bytes(0, T, D)
    per_b = max(1, _working_set_bytes(1, T, D) - fixed)
    bb = max(1, (budget_bytes - fixed) // per_b)
    bb = min(bb, max(1, pl.cdiv(B, 2)), B)
    for cand in range(bb, 0, -1):
        if B % cand == 0 and 3 * cand >= 2 * bb:
            return cand
    return bb


def attention_block(inputs, weight, bias):
    """inputs: (B, T, D); weight: (T, T); bias: (T,).
    Returns (attention_vec (B, D), attention_probs (B, T, D))."""
    B, T, D = inputs.shape

    cap = _vmem_capacity_bytes()
    # Generation-aware working-set target: ~3/8 of physical VMEM, clamped to
    # [4, 28] MiB (-> ~24 MiB on v7x's 64 MiB, ~28 MiB on v5e/v6e's 128 MiB).
    budget = max(4 << 20, min(28 << 20, (cap * 3) // 8))

    # The in-kernel leading-dim reshape around the matmul is layout-preserving
    # only when D is a multiple of the 8-row sublane tile; pad D in the rare
    # non-aligned case (zero columns are softmax-safe, sliced away below).
    Dp = _pad_up(D, 8)
    x = inputs
    if Dp != D:
        x = jnp.pad(inputs, ((0, 0), (0, 0), (0, Dp - D)))

    Bb = _pick_block_batch(B, T, Dp, budget)
    n_blocks = pl.cdiv(B, Bb)
    Bp = n_blocks * Bb
    if Bp != B:
        # Ragged batch: pad at most one block; zero rows are softmax-safe.
        x = jnp.pad(x, ((0, Bp - B), (0, 0), (0, 0)))

    wt = jnp.swapaxes(weight, 0, 1)      # tiny; lets the kernel use a plain 2-D dot
    bias3 = bias.reshape(1, T, 1)

    ws = _working_set_bytes(Bb, T, Dp)
    vmem_limit = int(min((cap * 3) // 4, max(32 << 20, 2 * ws)))

    vec3, probs = pl.pallas_call(
        _attn_kernel,
        out_shape=(
            jax.ShapeDtypeStruct((Bp, 1, Dp), inputs.dtype),
            jax.ShapeDtypeStruct((Bp, T, Dp), inputs.dtype),
        ),
        grid=(n_blocks,),
        in_specs=[
            pl.BlockSpec((Bb, T, Dp), lambda i: (i, 0, 0)),   # native-layout batch block
            pl.BlockSpec((T, T), lambda i: (0, 0)),           # W^T, stays resident
            pl.BlockSpec((1, T, 1), lambda i: (0, 0, 0)),     # bias, stays resident
        ],
        out_specs=(
            pl.BlockSpec((Bb, 1, Dp), lambda i: (i, 0, 0)),   # attention_vec block
            pl.BlockSpec((Bb, T, Dp), lambda i: (i, 0, 0)),   # attention_probs block
        ),
        compiler_params=pltpu.CompilerParams(
            dimension_semantics=("parallel",),
            vmem_limit_bytes=vmem_limit,
        ),
    )(x, wt, bias3)

    vec = vec3[:B, 0, :D]
    if Bp != B or Dp != D:
        probs = probs[:B, :, :D]
    return vec, probs


def attention_block_ref(inputs, weight, bias):
    """Pure-JAX reference mirroring the PyTorch forward, for validation."""
    inputs_t = jnp.swapaxes(inputs, 2, 1)                      # (B, D, T)
    attn_w = inputs_t @ weight.T + bias                        # (B, D, T)
    attn_p = jax.nn.softmax(attn_w, axis=-1)                   # (B, D, T)
    attn_p = jnp.swapaxes(attn_p, 2, 1)                        # (B, T, D)
    vec = jnp.sum(attn_p * inputs, axis=1)                     # (B, D)
    return vec, attn_p


if __name__ == "__main__":
    B, T, D = 2, 8, 32  # batch, time_step, dim

    key = jax.random.PRNGKey(0)
    k_x, k_w, k_b = jax.random.split(key, 3)

    inputs = jax.random.normal(k_x, (B, T, D), dtype=jnp.float32)
    # Deterministic nn.Linear(time_step, time_step) parameters (torch-like uniform init).
    bound = 1.0 / jnp.sqrt(T)
    weight = jax.random.uniform(k_w, (T, T), minval=-bound, maxval=bound, dtype=jnp.float32)
    bias = jax.random.uniform(k_b, (T,), minval=-bound, maxval=bound, dtype=jnp.float32)

    fn = jax.jit(attention_block)
    vec, probs = fn(inputs, weight, bias)
    jax.block_until_ready((vec, probs))

    vec_ref, probs_ref = attention_block_ref(inputs, weight, bias)
    assert vec.shape == (B, D) and probs.shape == (B, T, D)
    # Tolerance covers MXU multi-pass f32 matmul vs the XLA reference; the
    # softmax normalization itself is exact (approx=False reciprocal).
    assert jnp.allclose(vec, vec_ref, atol=1e-3, rtol=1e-3)
    assert jnp.allclose(probs, probs_ref, atol=1e-3, rtol=1e-3)

    print("KERNEL_OK")
</pallas_src>

<mosaic_0001>
module attributes {stable_mosaic.version = 11 : i64} {
  func.func @_attn_kernel(%arg0: i32, %arg1: memref<1x8x32xf32, #tpu.memory_space<vmem>>, %arg2: memref<8x8xf32, #tpu.memory_space<vmem>>, %arg3: memref<1x8x1xf32, #tpu.memory_space<vmem>>, %arg4: memref<1x1x32xf32, #tpu.memory_space<vmem>>, %arg5: memref<1x8x32xf32, #tpu.memory_space<vmem>>) attributes {dimension_semantics = [#tpu.dimension_semantics<parallel>], iteration_bounds = array<i64: 2>, scalar_prefetch = 0 : i64, scratch_operands = 0 : i64, tpu.core_type = #tpu.core_type<tc>, window_params = [{transform_indices = @transform_0, window_bounds = array<i64: 1, 8, 32>}, {pipeline_mode = #tpu.pipeline_mode<synchronous>, transform_indices = @transform_1, window_bounds = array<i64: 8, 8>}, {pipeline_mode = #tpu.pipeline_mode<synchronous>, transform_indices = @transform_2, window_bounds = array<i64: 1, 8, 1>}, {transform_indices = @transform_3, window_bounds = array<i64: 1, 1, 32>}, {transform_indices = @transform_4, window_bounds = array<i64: 1, 8, 32>}]} {
    %c0 = arith.constant 0 : index
    %c0_0 = arith.constant 0 : index
    %c0_1 = arith.constant 0 : index
    %0 = vector.load %arg1[%c0, %c0_0, %c0_1] : memref<1x8x32xf32, #tpu.memory_space<vmem>>, vector<1x8x32xf32>
    %1 = tpu.transpose %0, [0, 2, 1] : vector<1x8x32xf32> -> vector<1x32x8xf32>
    %2 = vector.shape_cast %1 : vector<1x32x8xf32> to vector<32x8xf32>
    %c0_2 = arith.constant 0 : index
    %c0_3 = arith.constant 0 : index
    %3 = vector.load %arg2[%c0_2, %c0_3] : memref<8x8xf32, #tpu.memory_space<vmem>>, vector<8x8xf32>
    %cst = arith.constant dense<0.000000e+00> : vector<32x8xf32>
    %4 = tpu.matmul %2, %3, %cst {dimension_numbers = #tpu.dot_dimension_numbers<[1], [0], [0], [1], [0, 0, 1, 1], [], []>} : vector<32x8xf32>, vector<8x8xf32>, vector<32x8xf32> -> vector<32x8xf32>
    %5 = vector.shape_cast %4 : vector<32x8xf32> to vector<1x32x8xf32>
    %6 = tpu.transpose %5, [0, 2, 1] : vector<1x32x8xf32> -> vector<1x8x32xf32>
    %c0_4 = arith.constant 0 : index
    %c0_5 = arith.constant 0 : index
    %c0_6 = arith.constant 0 : index
    %7 = vector.load %arg3[%c0_4, %c0_5, %c0_6] : memref<1x8x1xf32, #tpu.memory_space<vmem>>, vector<1x8x1xf32>
    %8 = vector.broadcast %7 : vector<1x8x1xf32> to vector<1x8x32xf32>
    %9 = arith.addf %6, %8 : vector<1x8x32xf32>
    %cst_7 = arith.constant dense<0xFF800000> : vector<1x32xf32>
    %10 = vector.multi_reduction <maximumf>, %9, %cst_7 [1] : vector<1x8x32xf32> to vector<1x32xf32>
    %11 = vector.shape_cast %10 : vector<1x32xf32> to vector<1x1x32xf32>
    %12 = vector.broadcast %11 : vector<1x1x32xf32> to vector<1x8x32xf32>
    %13 = arith.subf %9, %12 : vector<1x8x32xf32>
    %14 = math.exp %13 : vector<1x8x32xf32>
    %cst_8 = arith.constant dense<0.000000e+00> : vector<1x32xf32>
    %15 = vector.multi_reduction <add>, %14, %cst_8 [1] : vector<1x8x32xf32> to vector<1x32xf32>
    %16 = vector.shape_cast %15 : vector<1x32xf32> to vector<1x1x32xf32>
    %17 = tpu.reciprocal %16 : vector<1x1x32xf32> -> vector<1x1x32xf32>
    %18 = vector.broadcast %17 : vector<1x1x32xf32> to vector<1x8x32xf32>
    %19 = arith.mulf %14, %18 : vector<1x8x32xf32>
    %c0_9 = arith.constant 0 : index
    %c0_10 = arith.constant 0 : index
    %c0_11 = arith.constant 0 : index
    %20 = vector.load %arg5[%c0_9, %c0_10, %c0_11] : memref<1x8x32xf32, #tpu.memory_space<vmem>>, vector<1x8x32xf32>
    tpu.vector_store %arg5[%c0_9, %c0_10, %c0_11], %19 {strides = array<i32>} : memref<1x8x32xf32, #tpu.memory_space<vmem>>, vector<1x8x32xf32>,
    %21 = arith.mulf %14, %0 : vector<1x8x32xf32>
    %cst_12 = arith.constant dense<0.000000e+00> : vector<1x32xf32>
    %22 = vector.multi_reduction <add>, %21, %cst_12 [1] : vector<1x8x32xf32> to vector<1x32xf32>
    %23 = vector.shape_cast %22 : vector<1x32xf32> to vector<1x1x32xf32>
    %24 = arith.mulf %23, %17 : vector<1x1x32xf32>
    %c0_13 = arith.constant 0 : index
    %c0_14 = arith.constant 0 : index
    %c0_15 = arith.constant 0 : index
    %25 = vector.load %arg4[%c0_13, %c0_14, %c0_15] : memref<1x1x32xf32, #tpu.memory_space<vmem>>, vector<1x1x32xf32>
    tpu.vector_store %arg4[%c0_13, %c0_14, %c0_15], %24 {strides = array<i32>} : memref<1x1x32xf32, #tpu.memory_space<vmem>>, vector<1x1x32xf32>,
    return
  }
  func.func @transform_0(%arg0: i32) -> (i32, i32, i32) {
    %c0_i32 = arith.constant 0 : i32
    %c0_i32_0 = arith.constant 0 : i32
    %c0_i32_1 = arith.constant 0 : i32
    return %arg0, %c0_i32, %c0_i32_0 : i32, i32, i32
  }
  func.func @transform_1(%arg0: i32) -> (i32, i32) {
    %c0_i32 = arith.constant 0 : i32
    %c0_i32_0 = arith.constant 0 : i32
    %c0_i32_1 = arith.constant 0 : i32
    return %c0_i32, %c0_i32_0 : i32, i32
  }
  func.func @transform_2(%arg0: i32) -> (i32, i32, i32) {
    %c0_i32 = arith.constant 0 : i32
    %c0_i32_0 = arith.constant 0 : i32
    %c0_i32_1 = arith.constant 0 : i32
    %c0_i32_2 = arith.constant 0 : i32
    return %c0_i32, %c0_i32_0, %c0_i32_1 : i32, i32, i32
  }
  func.func @transform_3(%arg0: i32) -> (i32, i32, i32) {
    %c0_i32 = arith.constant 0 : i32
    %c0_i32_0 = arith.constant 0 : i32
    %c0_i32_1 = arith.constant 0 : i32
    return %arg0, %c0_i32, %c0_i32_0 : i32, i32, i32
  }
  func.func @transform_4(%arg0: i32) -> (i32, i32, i32) {
    %c0_i32 = arith.constant 0 : i32
    %c0_i32_0 = arith.constant 0 : i32
    %c0_i32_1 = arith.constant 0 : i32
    return %arg0, %c0_i32, %c0_i32_0 : i32, i32, i32
  }
}

</mosaic_0001>

<bundles_post_ra>
// kernel: attention_block.1
= control target key start
LH: loop header
LB: loop body
LE: loop exit
PB: predicated region body
PF: predicated region fallthrough
CT: control target
= control target key end

     0   :  { %10 = vsyncpa [#allocation3], 0  ;;  %s874_s0 = inlined_call_operand.vmem [shape: f32[2,8,32], index: 0, kind: input, shape index: {}]   ;;  %s875_s1 = inlined_call_operand.vmem [shape: f32[8,8], index: 1, kind: input, shape index: {}]   ;;  %s876_s2 = inlined_call_operand.vmem [shape: f32[1,8,1], index: 2, kind: input, shape index: {}]   ;;  %s877_s3 = inlined_call_operand.hbm [shape: f32[2,1,32], index: 3, kind: output, shape index: {0}]   ;;  %s878_s4 = inlined_call_operand.hbm [shape: f32[2,8,32], index: 4, kind: output, shape index: {1}]  }
   0x1   :  { %12 = vsyncpa [#allocation3 + $0x1], 0 }
   0x2   :  { %13 = vsyncpa [#allocation5], 0 }
   0x3   :  { %15 = vsyncpa [#allocation5 + $0x1], 0  ;;  %s729_s15 = smov 0   ;;  %s731_s16 = smov 0  }
   0x4   :  { %s733_s17 = smov 0   ;;  %s735_s18 = smov 0  }
   0x5 LB: > { %s750_s19 = sadd.s32 4294967295, %s699_s18   ;;  %s524_s20 = sadd.s32 4294967294, %s699_s18   ;;  %s699_s18 = sphi %s735_s18, %s884_s18   ;;  %s695_s17 = sphi %s733_s17, %s883_s17   ;;  %s691_s16 = sphi %s731_s16, %s882_s16   ;;  %s687_s15 = sphi %s729_s15, %s881_s15  }
   0x6   : > { %s754_s21 = sadd.s32 1, %s699_s18   ;;  %s96_s22 = sadd.s32 1, %s695_s17 }
   0x7   : > { %s93_s23 = ssub.s32 %s699_s18, %s754_s21  ;;  %p106_p0 = scmp.ne.s32.totalorder %s695_s17, %s691_s16 }
   0x8   : > { %p94_p1 = scmp.eq.s32.totalorder %s93_s23, 0  ;;  %p107_p2 = scmp.eq.s32.totalorder %s750_s19, 1 }
   0x9   : > { %p112_p3 = scmp.ne.s32.totalorder %s691_s16, %s687_s15  ;;  %p113_p4 = scmp.eq.s32.totalorder %s524_s20, 1 }
   0xa   : > { %s765_s24 = scalar_select %p94_p1, %s695_s17, %s96_s22  }
   0xb   : > { %p767_p5 = por %p107_p2, %p106_p0  ;;  %p771_p6 = por %p113_p4, %p112_p3 }
   0xc   : > { %p527_p7 = scmp.ge.s32.totalorder %s699_s18, 1  ;;  %p170_p8 = scmp.lt.s32.totalorder %s699_s18, 3 }
   0xe   : > { %p171_p9 = pnand %p527_p7, %p170_p8 }
   0xf   : > { %p199_p10 = scmp.lt.s32.totalorder (!%p171_p9), %s750_s19, 1  ;;  %v236_v1 = vld [vmem:[%s875_s1] sm:$0xff] (!%p171_p9)  ;;  %vm237_vm0 = vcmask (!%p171_p9), 64512   ;;  %v701_v6 = vmov (!%p171_p9), 0   ;;  %vm374_vm1 = vcmask (!%p171_p9), 261120   ;;  %s792_s10 = sand.u32 (!%p171_p9), 1, %s691_s16  }
  0x10   : > { %174 = sbr.rel (%p171_p9) target bundleno = 597 (0x255), region = 32  ;;  %544 = vmatprep.subr.mxu0 (!%p171_p9), %v236_v1  ;;  %552 = vmatprep.subr.mxu1 (!%p171_p9), %v236_v1  ;;  %v367_v7 = vld [vmem:[%s876_s2] sm:$0xff] (!%p171_p9)  ;;  %s528_s11 = sshll.u32 (!%p171_p9), %s792_s10, 3  ;;  %vm404_vm2 = vcmask (!%p171_p9), 253952  }
  0x11   : > { %545 = vmatpush3.msra.mxu0 (!%p171_p9), %v236_v1  ;;  %553 = vmatpush3.msra.mxu1 (!%p171_p9), %v236_v1  ;;  %s535_s12 = sshll.u32 (!%p171_p9), %s750_s19, 4  ;;  %s191_s13 = scalar_lea.vmem (!%p171_p9), [#allocation2], %s792_s10 }
  0x12   : > { %s424_s14 = sshll.u32 (!%p171_p9), %s191_s13, 4  ;;  %s536_s20 = sshll.u32 (!%p171_p9), %s750_s19, 7  ;;  %s803_s14 = int_to_ptr.vmem [resolvable:$true] %s424_s14 }
  0x13   : > { %s198_s22 = scalar_lea.vmem (!%p171_p9), [#allocation4], %s528_s11  ;;  %s801_s29 = scalar_lea.hbm (!%p171_p9), %s877_s3, %s535_s12 }
  0x14   : > { %s437_s23 = sshll.u32 (!%p171_p9), %s198_s22, 4  ;;  %s407_s6 = scalar_lea.sflag (!%p171_p9), [#allocation3], %s792_s10  ;;  %s810_s23 = int_to_ptr.vmem [resolvable:$true] %s437_s23 }
  0x15   : > { %s605_s7 = scalar_lea.vmem (!%p171_p9), %s803_s14, 16  ;;  %s702_s8 = smov (!%p171_p9), [#allocation2]  }
  0x16   : > { %p606_p11 = scmp.ne.s32.totalorder (!%p171_p9), %s803_s14, %s605_s7  ;;  %s609_s9 = sshll.u32 (!%p171_p9), %s702_s8, 4  ;;  %s610_s9 = int_to_ptr.vmem [resolvable:$false] %s609_s9 }
  0x17   : > { %s200_s27 = scalar_select %p199_p10, %s750_s19, 1 }
  0x18   : > { %s808_s19 = scalar_lea.hbm %s878_s4, %s536_s20  ;;  %p607_p12 = pnand %p606_p11, %p767_p5 }
  0x19   : > { %s529_s28 = sshll.u32 %s200_s27, 3  ;;  %s611_s11 = scalar_lea.vmem %s610_s9, 32 }
  0x1a   : > { %s202_s5 = scalar_lea.vmem %s874_s0, %s529_s28  ;;  %p608_p13 = pneg %p607_p12 }
  0x1b   : > { %v203_v0 = vld [vmem:[%s202_s5] sm:$0xff]  ;;  %p612_p0 = scmp.lt.s32.totalorder %s803_s14, %s610_s9  ;;  %p613_p1 = scmp.lt.s32.totalorder %s611_s11, %s605_s7 }
  0x1c   : > { %204 = vxpose.xlu0.b32.start.end [1/1] (short) (narrow) %v203_v0, 32 }
  0x1d   : > { %p614_p2 = por %p613_p1, %p612_p0 }
  0x1f   : > { %p615_p3 = pnand %p614_p2, %p608_p13 }
  0x45   : > { %600 = vset.pattern.permute.xlu0 %v701_v6 }
  0x51   : > { %370 = vperm.xlu0 %600, %v367_v7  }
  0x9c   : > { %v220_v2 = vpop.trf.xlu0 }
  0x9d   : > { %546 = vmatprep.mubr.msk.f32.mxu0 %vm237_vm0, %v220_v2 }
  0xa0   : > { %v221_v3 = vpop.trf.xlu0 }
  0xa1   : > { %547 = vmatmul.mubr.msk.f32.vlgmr.msra.gmra.mrb[0].mxu0 %vm237_vm0, %v221_v3 }
  0xa4   : > { %v222_v4 = vpop.trf.xlu0 }
  0xa5   : > { %549 = vmatprep.mubr.msk.f32.mxu1 %vm237_vm0, %v222_v4 }
  0xa8   : > { %v223_v5 = vpop.trf.xlu0 }
  0xa9   : > { %550 = vmatmul.mubr.msk.f32.vlgmr.msra.gmra.mrb[0].mxu1 %vm237_vm0, %v223_v5 }
  0xd0   : > { %v371_v12 = vpop.permute.xlu0 %370 }
 0x174   : > { %v548_v8 = vpop.f32.mrb[0].mxu0 }
 0x175   : > { %v316_v9 = vpop.f32.mrb[1].mxu0 }
 0x176   : > { %335 = vxpose.xlu1.b32.start [1/4] (short) (narrow) %v316_v9, 8 }
 0x17a   : > { %336 = vxpose.xlu1.b32.cont [2/4] (short) (narrow) %v548_v8, 8 }
 0x17c   : > { %v551_v10 = vpop.f32.mrb[0].mxu1 }
 0x17d   : > { %v326_v11 = vpop.f32.mrb[1].mxu1 }
 0x17e   : > { %337 = vxpose.xlu1.b32.cont [3/4] (short) (narrow) %v326_v11, 8 }
 0x182   : > { %338 = vxpose.xlu1.b32.end [4/4] (short) (narrow) %v551_v10, 8 }
 0x1f6   : > { %v351_v13 = vpop.trf.xlu1 }
 0x1f7   : > { %v373_v14 = vadd.f32 %v371_v12, %v351_v13 }
 0x1f9   : > { %v375_v15 = vsel %vm374_vm1, %v373_v14, -inf }
 0x1fa   : > { %v376_v16 = vrot.slane %v375_v15, 4 }
 0x1fc   : > { %v377_v17 = vmax.f32 %v375_v15, %v376_v16 }
 0x1fe   : > { %v378_v18 = vrot.slane %v377_v17, 2 }
 0x200   : > { %v379_v19 = vmax.f32 %v377_v17, %v378_v18 }
 0x202   : > { %v380_v20 = vrot.slane %v379_v19, 1 }
 0x204   : > { %v381_v21 = vmax.f32 %v379_v19, %v380_v20 }
 0x206   : > { %v382_v22 = vsub.f32 %v373_v14, %v381_v21 }
 0x208   : > { %v383_v23 = vmul.f32 1.442695, %v382_v22 }
 0x20a   : > { %601 = vpow2.f32 %v383_v23 }
 0x214   : > { %v602_v24 = vpop.eup %601 }
 0x215   : > { %v385_v25 = vsel %vm374_vm1, %v602_v24, 0.0  ;;  %v395_v26 = vmul.f32 %v602_v24, %v203_v0 }
 0x216   : > { %v386_v27 = vrot.slane %v385_v25, 4 }
 0x217   : > { %v396_v28 = vsel %vm374_vm1, %v395_v26, 0.0 }
 0x218   : > { %v387_v29 = vadd.f32 %v386_v27, %v385_v25  ;;  %v397_v30 = vrot.slane %v396_v28, 4 }
 0x21a   : > { %v388_v31 = vrot.slane %v387_v29, 2  ;;  %v398_v32 = vadd.f32 %v397_v30, %v396_v28 }
 0x21c   : > { %v389_v33 = vadd.f32 %v388_v31, %v387_v29  ;;  %v399_v35 = vrot.slane %v398_v32, 2 }
 0x21e   : > { %v390_v34 = vrot.slane %v389_v33, 1  ;;  %v400_v37 = vadd.f32 %v399_v35, %v398_v32 }
 0x220   : > { %v391_v36 = vadd.f32 %v390_v34, %v389_v33  ;;  %v401_v38 = vrot.slane %v400_v37, 1 }
 0x222   : > { %603 = vrcp.f32 %v391_v36  ;;  %v402_v39 = vadd.f32 %v401_v38, %v400_v37 }
 0x22c   : > { %v604_v40 = vpop.eup %603 }
 0x22d   : > { %v403_v41 = vmul.f32 %v604_v40, %v402_v39  ;;  %v393_v42 = vmul.f32 %v604_v40, %v602_v24 }
 0x22f   : > { %405 = vst.msk [vmem:[%s191_s13] sm:$0x1] %vm404_vm2, %v403_v41 }
 0x230   : > { %394 = vst.msk [vmem:[%s198_s22] sm:$0xff] %vm374_vm1, %v393_v42 }
 0x231   : > { %618 = shalt.err (!%p615_p3)
}
 0x232   : > { %s619_s12 = scalar_lea.hbm %s801_s29, 16  ;;  %s623_s22 = scalar_lea.hbm %s877_s3, 32 }
 0x233   : > { %p620_p4 = scmp.ne.s32.totalorder %s801_s29, %s619_s12  ;;  %p624_p9 = scmp.lt.u32.totalorder %s801_s29, %s877_s3 }
 0x234   : > { %p625_p10 = scmp.lt.u32.totalorder %s623_s22, %s619_s12  ;;  %p627_p12 = scmp.lt.u32.totalorder %s619_s12, %s801_s29 }
 0x235   : > { %p621_p7 = pnand %p620_p4, %p767_p5 }
 0x236   : > { %p626_p11 = por %p625_p10, %p624_p9 }
 0x237   : > { %p622_p8 = pneg %p621_p7 }
 0x238   : > { %p628_p13 = por %p627_p12, %p626_p11 }
 0x23a   : > { %p629_p0 = pnand %p628_p13, %p622_p8 }
 0x23c   : > { %632 = shalt.err (!%p629_p0)
}
 0x23d   : > { %554 = dma.vmem_to_hbm [thread:$0]  (%p767_p5), %s803_s14, 16, %s801_s29, %s407_s6  }
 0x23e   : > { %s411_s30 = scalar_lea.sflag [#allocation5], %s792_s10  ;;  %s633_s5 = scalar_lea.vmem %s810_s23, 128 }
 0x23f   : > { %p634_p1 = scmp.ne.s32.totalorder %s810_s23, %s633_s5  ;;  %s703_s7 = smov [#allocation4]  }
 0x240   : > { %s637_s8 = sshll.u32 %s703_s7, 4  ;;  %s638_s8 = int_to_ptr.vmem [resolvable:$false] %s637_s8 }
 0x241   : > { %p635_p2 = pnand %p634_p1, %p767_p5  ;;  %s639_s9 = scalar_lea.vmem %s638_s8, 256 }
 0x242   : > { %p640_p4 = scmp.lt.s32.totalorder %s810_s23, %s638_s8  ;;  %p641_p7 = scmp.lt.s32.totalorder %s639_s9, %s633_s5 }
 0x243   : > { %p636_p3 = pneg %p635_p2 }
 0x244   : > { %p642_p8 = por %p641_p7, %p640_p4 }
 0x246   : > { %p643_p9 = pnand %p642_p8, %p636_p3 }
 0x248   : > { %646 = shalt.err (!%p643_p9)
}
 0x249   : > { %s647_s10 = scalar_lea.hbm %s808_s19, 128  ;;  %s651_s6 = scalar_lea.hbm %s878_s4, 256 }
 0x24a   : > { %p648_p10 = scmp.ne.s32.totalorder %s808_s19, %s647_s10  ;;  %p652_p13 = scmp.lt.u32.totalorder %s808_s19, %s878_s4 }
 0x24b   : > { %p653_p0 = scmp.lt.u32.totalorder %s651_s6, %s647_s10  ;;  %p655_p2 = scmp.lt.u32.totalorder %s647_s10, %s808_s19 }
 0x24c   : > { %p649_p11 = pnand %p648_p10, %p767_p5 }
 0x24d   : > { %p654_p1 = por %p653_p0, %p652_p13 }
 0x24e   : > { %p650_p12 = pneg %p649_p11 }
 0x24f   : > { %p656_p3 = por %p655_p2, %p654_p1 }
 0x251   : > { %p657_p4 = pnand %p656_p3, %p650_p12 }
 0x253   : > { %660 = shalt.err (!%p657_p4)
}
 0x254   : > { %555 = dma.vmem_to_hbm [thread:$0]  (%p767_p5), %s810_s23, 128, %s808_s19, %s411_s30  }
 0x255 PF: > { %p565_p7 = scmp.ge.s32.totalorder %s699_s18, 2  ;;  %s449_s13 = sand.u32 1, %s687_s15  }
 0x256   : > { %s450_s20 = scalar_lea.sflag [#allocation3], %s449_s13 }
 0x257   : > { %p559_p8 = pnand %p565_p7, %p771_p6 }
 0x259   : > { %678 = dma.done.wait (!%p559_p8), %s450_s20, 16  }
 0x25a   : > { %680 = vsyncadd (!%p559_p8), %s450_s20, 4294967280  ;;  %s458_s22 = scalar_lea.sflag [#allocation5], %s449_s13 }
 0x25b   : > { %682 = dma.done.wait (!%p559_p8), %s458_s22, 128  }
 0x25c   : > { %684 = vsyncadd (!%p559_p8), %s458_s22, 4294967168  ;;  %p18_p5 = scmp.ge.s32.totalorder %s754_s21, 4   ;;  %s881_s15 = smov %s691_s16 }
 0x25d   : > { %s882_s16 = smov %s695_s17  ;;  %s883_s17 = smov %s765_s24 }
 0x25e   : > { %s884_s18 = smov %s754_s21  ;;  %20 = sbr.rel (!%p18_p5) target bundleno = 5 (0x5), region = 84 }
 0x265   :  { %463 = vsyncpa [#allocation3], 1 }
 0x266   :  { %465 = vsyncpa [#allocation3 + $0x1], 1 }
 0x267   :  { %466 = vsyncpa [#allocation5], 1 }
 0x268   :  { %468 = vsyncpa [#allocation5 + $0x1], 1 }

</bundles_post_ra>
